<compile_context>
chip_gen: v7x
topology: tpu7x:2x2x1
jax: 0.10.0
libtpu: 0.0.40
codegen_flags: <defaults>
</compile_context>

<pallas_src>
import functools

import jax
import jax.numpy as jnp
from jax import lax
from jax.experimental import pallas as pl
from jax.experimental.pallas import tpu as pltpu

_LANES = 128
_MAX_BLOCK_ROWS = 2048        # 2048 x 128 x 4 B = 1 MiB per f32 block
_NEG_BIG = -1.0e30            # exp(_NEG_BIG - max) underflows to 0
_NUM_SHARDS = 2               # leading "parallel" axis -> both TCs on v7x


def _circle_logits(x_f32, *, is_positive, m, gamma):
    # VALU-lean circle logits:
    #   positive: t=(1+m)-sp; ap=max(t,0); logit = ap*((1-m)-sp)*g == -ap*(sp-dp)*g
    #   negative: t=sn+m;     an=max(t,0); logit = an*(sn-m)*g     ==  an*(sn-dn)*g
    if is_positive:
        t = (1.0 + m) - x_f32
    else:
        t = x_f32 + m
    return (jnp.maximum(t, 0.0) * (t - 2.0 * m)) * gamma


def _lse_block_kernel(x_ref, out_ref, m_sc, s_sc, *,
                      is_positive, m, gamma,
                      total_rows, block_rows, blocks_per_shard):
    shard = pl.program_id(0)
    step = pl.program_id(1)
    last = pl.num_programs(1) - 1

    # Logical (unclamped) block index; a shard's trailing steps past the end
    # of the array have rows_valid <= 0 and contribute nothing.
    gstep = shard * blocks_per_shard + step
    rows_valid = total_rows - gstep * block_rows          # scalar int32

    x = x_ref[...].astype(jnp.float32)                    # narrow DMA, widen here
    logit = _circle_logits(x, is_positive=is_positive, m=m, gamma=gamma)

    # Row-granular mask on the (block_rows, 1) reduction columns only
    # (~1/128 of the elements) -> applying it on every block is ~free.
    row_ids = lax.broadcasted_iota(jnp.int32, (block_rows, 1), 0)
    row_ok = row_ids < rows_valid

    row_max = jnp.max(logit, axis=1, keepdims=True)       # (block_rows, 1)
    row_max = jnp.where(row_ok, row_max, _NEG_BIG)
    bm = jnp.max(row_max, axis=0, keepdims=True)          # (1, 1) block max

    e = jnp.exp(logit - bm)                               # garbage rows may be inf/NaN...
    row_sum = jnp.sum(e, axis=1, keepdims=True)
    row_sum = jnp.where(row_ok, row_sum, 0.0)             # ...but are zeroed here
    bs = jnp.sum(row_sum, axis=0, keepdims=True)          # (1, 1) block rescaled sum

    @pl.when(step == 0)
    def _():
        m_sc[...] = bm
        s_sc[...] = bs

    @pl.when(step != 0)
    def _():
        m_old = m_sc[...]
        m_new = jnp.maximum(m_old, bm)
        s_sc[...] = (s_sc[...] * jnp.exp(m_old - m_new)
                     + bs * jnp.exp(bm - m_new))
        m_sc[...] = m_new

    @pl.when(step == last)
    def _():
        lse = m_sc[...] + jnp.log(s_sc[...])              # (1,1); -inf if shard empty
        out_ref[...] = jnp.broadcast_to(lse, out_ref.shape)


def _circle_lse(x, *, is_positive, m, gamma):
    """logsumexp of circle logits over all elements of x (any shape, flattened)."""
    flat = x.reshape(-1)                                  # keep caller dtype (bf16 ok)
    n = flat.shape[0]
    if n == 0:
        return jnp.float32(-jnp.inf)                      # degenerate, matches torch

    rows = n // _LANES
    n_main = rows * _LANES
    parts = []

    if rows > 0:
        if n_main == n:
            main = flat.reshape(rows, _LANES)             # zero-copy fast path
        else:
            # TODO(synk): XLA materializes this prefix slice (one extra HBM
            # round trip); pass 128-aligned score counts to hit the fast path.
            main = flat[:n_main].reshape(rows, _LANES)

        block_rows = rows if rows <= _MAX_BLOCK_ROWS else _MAX_BLOCK_ROWS
        num_blocks = pl.cdiv(rows, block_rows)
        num_shards = _NUM_SHARDS if num_blocks >= _NUM_SHARDS else 1
        blocks_per_shard = pl.cdiv(num_blocks, num_shards)

        kernel = functools.partial(
            _lse_block_kernel,
            is_positive=is_positive, m=float(m), gamma=float(gamma),
            total_rows=rows, block_rows=block_rows,
            blocks_per_shard=blocks_per_shard)

        def in_map(c, i):
            # Clamp so a shard's trailing (fully masked) steps re-read a valid
            # block instead of going out of range.
            return (jnp.minimum(c * blocks_per_shard + i, num_blocks - 1), 0)

        out = pl.pallas_call(
            kernel,
            out_shape=jax.ShapeDtypeStruct((num_shards * 8, _LANES), jnp.float32),
            grid=(num_shards, blocks_per_shard),
            in_specs=[pl.BlockSpec((block_rows, _LANES), in_map)],
            out_specs=pl.BlockSpec((8, _LANES), lambda c, i: (c, 0)),
            scratch_shapes=[pltpu.VMEM((1, 1), jnp.float32),
                            pltpu.VMEM((1, 1), jnp.float32)],
            compiler_params=pltpu.CompilerParams(
                dimension_semantics=("parallel", "arbitrary"),
                vmem_limit_bytes=32 * 1024 * 1024),
        )(main)
        parts.append(out[0::8, 0])                        # (num_shards,) partial LSEs

    if n_main != n:
        tail = flat[n_main:].astype(jnp.float32)          # < 128 elements, plain JAX
        tl = _circle_logits(tail, is_positive=is_positive, m=m, gamma=gamma)
        mx = jnp.max(tl)
        parts.append(jnp.reshape(mx + jnp.log(jnp.sum(jnp.exp(tl - mx))), (1,)))

    p = jnp.concatenate(parts)
    # Stable combine of partial logsumexps (some may be -inf).
    mx = jnp.max(p)
    mx_safe = jnp.where(jnp.isfinite(mx), mx, jnp.float32(0.0))
    return mx + jnp.log(jnp.sum(jnp.exp(p - mx_safe)))


def circle_loss(sp, sn, m: float = 0.25, gamma: float = 64.0):
    """Pallas implementation of CircleLoss.forward(sp, sn) -> scalar."""
    lse_p = _circle_lse(sp, is_positive=True, m=m, gamma=gamma)
    lse_n = _circle_lse(sn, is_positive=False, m=m, gamma=gamma)
    z = lse_n + lse_p
    # numerically-stable softplus: max(z, 0) + log1p(exp(-|z|))
    return jnp.maximum(z, 0.0) + jnp.log1p(jnp.exp(-jnp.abs(z)))


def _circle_loss_ref(sp, sn, m=0.25, gamma=64.0):
    sp = sp.astype(jnp.float32)
    sn = sn.astype(jnp.float32)
    ap = jnp.maximum(-sp + 1.0 + m, 0.0)
    an = jnp.maximum(sn + m, 0.0)
    logit_p = -ap * (sp - (1.0 - m)) * gamma
    logit_n = an * (sn - m) * gamma
    z = jax.scipy.special.logsumexp(logit_n) + jax.scipy.special.logsumexp(logit_p)
    return jax.nn.softplus(z)


if __name__ == "__main__":
    m, gamma = 0.25, 64.0
    keys = jax.random.split(jax.random.PRNGKey(0), 6)

    def _check(sp, sn, tag, rtol=1e-5, atol=1e-5):
        loss = circle_loss(sp, sn, m=m, gamma=gamma)
        jax.block_until_ready(loss)
        ref = _circle_loss_ref(sp, sn, m=m, gamma=gamma)
        assert jnp.allclose(loss, ref, rtol=rtol, atol=atol), (tag, loss, ref)

    # (A) small, 128-aligned (zero-copy fast path), unequal lengths.
    sp = jax.random.uniform(keys[0], (1024,), minval=-1.0, maxval=1.0)
    sn = jax.random.uniform(keys[1], (1536,), minval=-1.0, maxval=1.0)
    _check(sp, sn, "aligned-small")

    # (B) bf16 scores, unaligned lengths (<128 tails outside the kernel),
    #     len(sp) << len(sn).
    sp = jax.random.uniform(keys[2], (300,), minval=-1.0, maxval=1.0).astype(jnp.bfloat16)
    sn = jax.random.uniform(keys[3], (5017,), minval=-1.0, maxval=1.0).astype(jnp.bfloat16)
    _check(sp, sn, "bf16-unaligned", rtol=1e-4, atol=1e-4)

    # (C) production block size: 2560 rows -> two 2048-row blocks across the
    #     2-shard parallel axis, second block partial (row mask); sn exercises
    #     the unaligned prefix+tail path in the same call.
    sp = jax.random.uniform(keys[4], (2560 * 128,), minval=-1.0, maxval=1.0)
    sn = jax.random.uniform(keys[5], (200_000,), minval=-1.0, maxval=1.0)
    _check(sp, sn, "multi-block", rtol=1e-4, atol=1e-4)

    print("KERNEL_OK")
</pallas_src>

<mosaic_0001>
module attributes {stable_mosaic.version = 11 : i64} {
  func.func @_lse_block_kernel(%arg0: i32, %arg1: i32, %arg2: memref<8x128xf32, #tpu.memory_space<vmem>>, %arg3: memref<8x128xf32, #tpu.memory_space<vmem>>, %arg4: memref<1x1xf32, #tpu.memory_space<vmem>>, %arg5: memref<1x1xf32, #tpu.memory_space<vmem>>) attributes {dimension_semantics = [#tpu.dimension_semantics<parallel>, #tpu.dimension_semantics<arbitrary>], iteration_bounds = array<i64: 1, 1>, scalar_prefetch = 0 : i64, scratch_operands = 2 : i64, tpu.core_type = #tpu.core_type<tc>, window_params = [{transform_indices = @transform_0, window_bounds = array<i64: 8, 128>}, {transform_indices = @transform_1, window_bounds = array<i64: 8, 128>}]} {
    %c1_i32 = arith.constant 1 : i32
    %0 = arith.muli %arg0, %c1_i32 : i32
    %1 = arith.addi %0, %arg1 : i32
    %c8_i32 = arith.constant 8 : i32
    %2 = arith.muli %1, %c8_i32 : i32
    %c8_i32_0 = arith.constant 8 : i32
    %3 = arith.subi %c8_i32_0, %2 : i32
    %c0 = arith.constant 0 : index
    %c0_1 = arith.constant 0 : index
    %4 = vector.load %arg2[%c0, %c0_1] : memref<8x128xf32, #tpu.memory_space<vmem>>, vector<8x128xf32>
    %cst = arith.constant 1.250000e+00 : f32
    %5 = vector.broadcast %cst : f32 to vector<8x128xf32>
    %6 = arith.subf %5, %4 : vector<8x128xf32>
    %cst_2 = arith.constant 0.000000e+00 : f32
    %7 = vector.broadcast %cst_2 : f32 to vector<8x128xf32>
    %8 = arith.maximumf %6, %7 : vector<8x128xf32>
    %cst_3 = arith.constant 5.000000e-01 : f32
    %9 = vector.broadcast %cst_3 : f32 to vector<8x128xf32>
    %10 = arith.subf %6, %9 : vector<8x128xf32>
    %11 = arith.mulf %8, %10 : vector<8x128xf32>
    %cst_4 = arith.constant 6.400000e+01 : f32
    %12 = vector.broadcast %cst_4 : f32 to vector<8x128xf32>
    %13 = arith.mulf %11, %12 : vector<8x128xf32>
    %14 = tpu.iota {dimensions = array<i32: 0>} : vector<8x1xi32>
    %15 = vector.broadcast %3 : i32 to vector<8x1xi32>
    %16 = arith.cmpi slt, %14, %15 : vector<8x1xi32>
    %cst_5 = arith.constant dense<0xFF800000> : vector<8xf32>
    %17 = vector.multi_reduction <maximumf>, %13, %cst_5 [1] : vector<8x128xf32> to vector<8xf32>
    %18 = vector.shape_cast %17 : vector<8xf32> to vector<8x1xf32>
    %cst_6 = arith.constant -1.000000e+30 : f32
    %19 = vector.broadcast %cst_6 : f32 to vector<8x1xf32>
    %20 = arith.select %16, %18, %19 : vector<8x1xi1>, vector<8x1xf32>
    %cst_7 = arith.constant dense<0xFF800000> : vector<1xf32>
    %21 = vector.multi_reduction <maximumf>, %20, %cst_7 [0] : vector<8x1xf32> to vector<1xf32>
    %22 = vector.shape_cast %21 : vector<1xf32> to vector<1x1xf32>
    %23 = vector.broadcast %22 : vector<1x1xf32> to vector<8x128xf32>
    %24 = arith.subf %13, %23 : vector<8x128xf32>
    %25 = math.exp %24 : vector<8x128xf32>
    %cst_8 = arith.constant dense<0.000000e+00> : vector<8xf32>
    %26 = vector.multi_reduction <add>, %25, %cst_8 [1] : vector<8x128xf32> to vector<8xf32>
    %27 = vector.shape_cast %26 : vector<8xf32> to vector<8x1xf32>
    %cst_9 = arith.constant 0.000000e+00 : f32
    %28 = vector.broadcast %cst_9 : f32 to vector<8x1xf32>
    %29 = arith.select %16, %27, %28 : vector<8x1xi1>, vector<8x1xf32>
    %cst_10 = arith.constant dense<0.000000e+00> : vector<1xf32>
    %30 = vector.multi_reduction <add>, %29, %cst_10 [0] : vector<8x1xf32> to vector<1xf32>
    %31 = vector.shape_cast %30 : vector<1xf32> to vector<1x1xf32>
    %c0_i32 = arith.constant 0 : i32
    %32 = arith.cmpi eq, %arg1, %c0_i32 : i32
    %33 = arith.extui %32 : i1 to i32
    %c0_i32_11 = arith.constant 0 : i32
    %34 = arith.cmpi ne, %33, %c0_i32_11 : i32
    scf.if %34 {
      %c0_16 = arith.constant 0 : index
      %c0_17 = arith.constant 0 : index
      %41 = vector.load %arg4[%c0_16, %c0_17] : memref<1x1xf32, #tpu.memory_space<vmem>>, vector<1x1xf32>
      tpu.vector_store %arg4[%c0_16, %c0_17], %22 {strides = array<i32>} : memref<1x1xf32, #tpu.memory_space<vmem>>, vector<1x1xf32>,
      %c0_18 = arith.constant 0 : index
      %c0_19 = arith.constant 0 : index
      %42 = vector.load %arg5[%c0_18, %c0_19] : memref<1x1xf32, #tpu.memory_space<vmem>>, vector<1x1xf32>
      tpu.vector_store %arg5[%c0_18, %c0_19], %31 {strides = array<i32>} : memref<1x1xf32, #tpu.memory_space<vmem>>, vector<1x1xf32>,
    } else {
    }
    %c0_i32_12 = arith.constant 0 : i32
    %35 = arith.cmpi ne, %arg1, %c0_i32_12 : i32
    %36 = arith.extui %35 : i1 to i32
    %c0_i32_13 = arith.constant 0 : i32
    %37 = arith.cmpi ne, %36, %c0_i32_13 : i32
    scf.if %37 {
      %c0_16 = arith.constant 0 : index
      %c0_17 = arith.constant 0 : index
      %41 = vector.load %arg4[%c0_16, %c0_17] : memref<1x1xf32, #tpu.memory_space<vmem>>, vector<1x1xf32>
      %42 = arith.maximumf %41, %22 : vector<1x1xf32>
      %c0_18 = arith.constant 0 : index
      %c0_19 = arith.constant 0 : index
      %43 = vector.load %arg5[%c0_18, %c0_19] : memref<1x1xf32, #tpu.memory_space<vmem>>, vector<1x1xf32>
      %44 = arith.subf %41, %42 : vector<1x1xf32>
      %45 = math.exp %44 : vector<1x1xf32>
      %46 = arith.mulf %43, %45 : vector<1x1xf32>
      %47 = arith.subf %22, %42 : vector<1x1xf32>
      %48 = math.exp %47 : vector<1x1xf32>
      %49 = arith.mulf %31, %48 : vector<1x1xf32>
      %50 = arith.addf %46, %49 : vector<1x1xf32>
      %c0_20 = arith.constant 0 : index
      %c0_21 = arith.constant 0 : index
      %51 = vector.load %arg5[%c0_20, %c0_21] : memref<1x1xf32, #tpu.memory_space<vmem>>, vector<1x1xf32>
      tpu.vector_store %arg5[%c0_20, %c0_21], %50 {strides = array<i32>} : memref<1x1xf32, #tpu.memory_space<vmem>>, vector<1x1xf32>,
      %c0_22 = arith.constant 0 : index
      %c0_23 = arith.constant 0 : index
      %52 = vector.load %arg4[%c0_22, %c0_23] : memref<1x1xf32, #tpu.memory_space<vmem>>, vector<1x1xf32>
      tpu.vector_store %arg4[%c0_22, %c0_23], %42 {strides = array<i32>} : memref<1x1xf32, #tpu.memory_space<vmem>>, vector<1x1xf32>,
    } else {
    }
    %c0_i32_14 = arith.constant 0 : i32
    %38 = arith.cmpi eq, %arg1, %c0_i32_14 : i32
    %39 = arith.extui %38 : i1 to i32
    %c0_i32_15 = arith.constant 0 : i32
    %40 = arith.cmpi ne, %39, %c0_i32_15 : i32
    scf.if %40 {
      %c0_16 = arith.constant 0 : index
      %c0_17 = arith.constant 0 : index
      %41 = vector.load %arg4[%c0_16, %c0_17] : memref<1x1xf32, #tpu.memory_space<vmem>>, vector<1x1xf32>
      %c0_18 = arith.constant 0 : index
      %c0_19 = arith.constant 0 : index
      %42 = vector.load %arg5[%c0_18, %c0_19] : memref<1x1xf32, #tpu.memory_space<vmem>>, vector<1x1xf32>
      %43 = math.log %42 : vector<1x1xf32>
      %44 = arith.addf %41, %43 : vector<1x1xf32>
      %45 = vector.shape_cast %44 : vector<1x1xf32> to vector<1x1xf32>
      %46 = vector.broadcast %45 : vector<1x1xf32> to vector<8x128xf32>
      %c0_20 = arith.constant 0 : index
      %c0_21 = arith.constant 0 : index
      %47 = vector.load %arg3[%c0_20, %c0_21] : memref<8x128xf32, #tpu.memory_space<vmem>>, vector<8x128xf32>
      tpu.vector_store %arg3[%c0_20, %c0_21], %46 {strides = array<i32>} : memref<8x128xf32, #tpu.memory_space<vmem>>, vector<8x128xf32>,
    } else {
    }
    return
  }
  func.func @transform_0(%arg0: i32, %arg1: i32) -> (i32, i32) {
    %c1_i32 = arith.constant 1 : i32
    %0 = arith.muli %arg0, %c1_i32 : i32
    %1 = arith.addi %0, %arg1 : i32
    %c0_i32 = arith.constant 0 : i32
    %2 = arith.minsi %1, %c0_i32 : i32
    %c0_i32_0 = arith.constant 0 : i32
    %c0_i32_1 = arith.constant 0 : i32
    return %2, %c0_i32_0 : i32, i32
  }
  func.func @transform_1(%arg0: i32, %arg1: i32) -> (i32, i32) {
    %c0_i32 = arith.constant 0 : i32
    %c0_i32_0 = arith.constant 0 : i32
    return %arg0, %c0_i32 : i32, i32
  }
}

</mosaic_0001>

<bundles_post_ra>
// kernel: tpu_custom_call.1
= control target key start
LH: loop header
LB: loop body
LE: loop exit
PB: predicated region body
PF: predicated region fallthrough
CT: control target
= control target key end

     0   :  { %6 = vsyncpa [#allocation5], 0  ;;  %s221_s0 = inlined_call_operand.hbm [shape: f32[8,128], index: 0, kind: input, shape index: {}]   ;;  %s222_s1 = inlined_call_operand.hbm [shape: f32[8,128], index: 1, kind: output, shape index: {}]  }
   0x1   :  { %7 = vsyncpa [#allocation6], 0  ;;  %s182_s6 = smov [#allocation4]   ;;  %s134_s10 = scalar_lea.hbm %s221_s0, 128 }
   0x2   :  { %s19_s7 = sshll.u32 %s182_s6, 4  ;;  %p135_p0 = scmp.ne.s32.totalorder %s221_s0, %s134_s10  ;;  %s20_s7 = int_to_ptr.vmem [resolvable:$true] %s19_s7 }
   0x3   :  { %p138_p1 = scmp.lt.u32.totalorder %s134_s10, %s221_s0 }
   0x5   :  { %p140_p2 = pnand %p138_p1, %p135_p0 }
   0x7   :  { %143 = shalt.err (!%p140_p2)
}
   0x8   :  { %s144_s15 = scalar_lea.vmem %s20_s7, 128  ;;  %p149_p4 = scmp.lt.s32.totalorder %s20_s7, %s20_s7 }
   0x9   :  { %p145_p3 = scmp.ne.s32.totalorder %s20_s7, %s144_s15  ;;  %p150_p5 = scmp.lt.s32.totalorder %s144_s15, %s144_s15 }
   0xb   :  { %p151_p6 = por %p150_p5, %p149_p4 }
   0xd   :  { %p152_p7 = pnand %p151_p6, %p145_p3 }
   0xf   :  { %155 = shalt.err (!%p152_p7)
}
  0x10   :  { %22 = dma.hbm_to_vmem [thread:$0]  %s221_s0, 128, %s20_s7, [#allocation5]  }
  0x11   :  { %178 = dma.done.wait [#allocation5], 128  }
  0x12   :  { %179 = vsyncadd [#allocation5], 4294967168  ;;  %v32_v0 = vld [vmem:[#allocation4] sm:$0xff]  ;;  %vm67_vm0 = vcmask 0   ;;  %v183_v16 = vmov 0   ;;  %v98_v25 = vlaneseq  ;;  %s184_s0 = smov [#allocation7]  }
  0x13   :  { %v33_v1 = vsub.f32 1.25, %v32_v0  ;;  %128 = vset.pattern.permute.xlu1 %v183_v16  ;;  %129 = vset.pattern.permute.xlu0 %v183_v16  ;;  %s113_s18 = sshll.u32 %s184_s0, 4  ;;  %s114_s18 = int_to_ptr.vmem [resolvable:$true] %s113_s18 }
  0x14   :  { %v99_v26 = vshrl.u32 %v98_v25, 7  ;;  %s156_s19 = scalar_lea.vmem %s114_s18, 128  ;;  %p161_p9 = scmp.lt.s32.totalorder %s114_s18, %s114_s18 }
  0x15   :  { %v34_v2 = vmax.f32 %v33_v1, 0.0  ;;  %v124_v3 = vadd.f32 -0.5, %v33_v1  ;;  %p157_p8 = scmp.ne.s32.totalorder %s114_s18, %s156_s19  ;;  %p162_p10 = scmp.lt.s32.totalorder %s156_s19, %s156_s19 }
  0x16   :  { %v100_v29 = vsub.s32 0, %v99_v26 }
  0x17   :  { %v36_v4 = vmul.f32 %v124_v3, %v34_v2  ;;  %p163_p11 = por %p162_p10, %p161_p9 }
  0x19   :  { %v37_v5 = vmul.f32 64.0, %v36_v4  ;;  %p164_p12 = pnand %p163_p11, %p157_p8 }
  0x1b   :  { %42 = vmax.xlane.f32.xlu0 %v37_v5 }
  0xa8   :  { %v43_v6 = vpop.xlane.xlu0 %42 }
  0xa9   :  { %v45_v7 = vrot.slane %v43_v6, 4 }
  0xab   :  { %v46_v8 = vmax.f32 %v43_v6, %v45_v7 }
  0xad   :  { %v47_v9 = vrot.slane %v46_v8, 2 }
  0xaf   :  { %v48_v10 = vmax.f32 %v46_v8, %v47_v9 }
  0xb1   :  { %v49_v11 = vrot.slane %v48_v10, 1 }
  0xb3   :  { %v50_v12 = vmax.f32 %v48_v10, %v49_v11 }
  0xb5   :  { %v51_v13 = vsub.f32 %v37_v5, %v50_v12  ;;  %68 = vst.msk [vmem:[#allocation2] sm:$0x1] %vm67_vm0, %v50_v12 }
  0xb7   :  { %v52_v14 = vmul.f32 1.442695, %v51_v13 }
  0xb9   :  { %130 = vpow2.f32 %v52_v14 }
  0xbc   :  { %v92_v30 = vld [vmem:[#allocation2] sm:$0x1] }
  0xc3   :  { %v131_v15 = vpop.eup %130 }
  0xc4   :  { %54 = vadd.xlane.f32.xlu0 %v131_v15 }
 0x151   :  { %v55_v17 = vpop.xlane.xlu0 %54 }
 0x152   :  { %v57_v18 = vrot.slane %v55_v17, 4 }
 0x154   :  { %v58_v19 = vadd.f32 %v57_v18, %v55_v17 }
 0x156   :  { %v59_v20 = vrot.slane %v58_v19, 2 }
 0x158   :  { %v60_v21 = vadd.f32 %v59_v20, %v58_v19 }
 0x15a   :  { %v61_v22 = vrot.slane %v60_v21, 1 }
 0x15c   :  { %v62_v23 = vadd.f32 %v61_v22, %v60_v21 }
 0x15e   :  { %69 = vst.msk [vmem:[#allocation3] sm:$0x1] %vm67_vm0, %v62_v23 }
 0x165   :  { %v93_v24 = vld [vmem:[#allocation3] sm:$0x1] }
 0x166   :  { %132 = vlog2.f32 %v93_v24 }
 0x170   :  { %v133_v27 = vpop.eup %132 }
 0x171   :  { %v95_v28 = vmul.f32 0.6931472, %v133_v27 }
 0x173   :  { %v96_v31 = vadd.f32 %v95_v28, %v92_v30 }
 0x175   :  { %v101_v32 = vrot.slane %v96_v31, %v100_v29 }
 0x177   :  { %103 = vperm.xlu1 %128, %v101_v32  }
 0x1f6   :  { %v104_v33 = vpop.permute.xlu1 %103 }
 0x1f7   :  { %106 = vst [vmem:[#allocation7] sm:$0xff] %v104_v33 }
 0x1f8   :  { %167 = shalt.err (!%p164_p12)
}
 0x1f9   :  { %s168_s22 = scalar_lea.hbm %s222_s1, 128 }
 0x1fa   :  { %p169_p13 = scmp.ne.s32.totalorder %s222_s1, %s168_s22  ;;  %p172_p0 = scmp.lt.u32.totalorder %s168_s22, %s222_s1 }
 0x1fc   :  { %p174_p1 = pnand %p172_p0, %p169_p13 }
 0x1fe   :  { %177 = shalt.err (!%p174_p1)
}
 0x1ff   :  { %116 = dma.vmem_to_hbm [thread:$0]  %s114_s18, 128, %s222_s1, [#allocation6]  }
 0x200   :  { %180 = dma.done.wait [#allocation6], 128  }
 0x201   :  { %181 = vsyncadd [#allocation6], 4294967168 }
 0x202   :  { %120 = vsyncpa [#allocation5], 1 }
 0x203   :  { %121 = vsyncpa [#allocation6], 1 }

</bundles_post_ra>
